<compile_context>
chip_gen: v7x
topology: tpu7x:2x2x1
jax: 0.10.0
libtpu: 0.0.40
codegen_flags: <defaults>
</compile_context>

<pallas_src>
import jax
import jax.numpy as jnp
from jax.experimental import pallas as pl
from jax.experimental.pallas import tpu as pltpu

IN_FEATURES = 1000
OUT_FEATURES = 3
N_PAD = 8  # pad 3 -> 8 output lanes (full-dim block); 16x less writeback than padding to 128


def _round_up(x, m):
    return ((x + m - 1) // m) * m


def classify_kernel(x_ref, w_ref, b_ref, o_ref):
    # x_ref: (TB, 1000) f32 (pipelined) | w_ref: (1000, 8) bf16 (VMEM-resident) | b_ref: (1, 8) f32
    x = x_ref[...].astype(w_ref.dtype)  # in-kernel bf16 cast: VPU work, hidden under the DMA
    acc = jnp.dot(x, w_ref[...], preferred_element_type=jnp.float32)  # MXU, f32 accumulation
    o_ref[...] = acc + b_ref[...]  # f32 bias add, (TB, 8) store


def classify_head(feat, w, b, *, weight_dtype=jnp.bfloat16, block_b=512):
    """poolFormer.Classify: logits = feat @ w + b.

    feat : (B, 1000) float32  -- PoolFormer backbone output (consumed as-is: no pad/cast pass)
    w    : (1000, 3) float32  -- transposed PyTorch weight (W.T), so the kernel does x @ W + b
    b    : (3,)      float32
    returns (B, 3) float32
    """
    B, K = feat.shape
    N = w.shape[1]

    # Batch tile: large tiles amortize the ~0.35 us/step overhead; when B > 16 cap the tile at
    # round_up(cdiv(B, 2), 16) so there are >= 2 grid steps for the v7x 2-TC "parallel" split.
    if B <= 16:
        TB = _round_up(B, 8)
    else:
        TB = min(block_b, _round_up(pl.cdiv(B, 2), 16))
    grid = (pl.cdiv(B, TB),)  # non-divisible B handled by Pallas partial blocks (masked store)

    # Tiny operands only: pad/cast weight (1000,3)->(1000,8) bf16 and bias (3,)->(1,8) f32.
    w_p = jnp.pad(w, ((0, 0), (0, N_PAD - N))).astype(weight_dtype)
    b_p = jnp.pad(b.astype(jnp.float32), (0, N_PAD - N)).reshape(1, N_PAD)

    cost = pl.CostEstimate(
        flops=2 * B * K * N_PAD,
        transcendentals=0,
        bytes_accessed=(
            B * K * feat.dtype.itemsize          # feature read (dominant)
            + K * N_PAD * w_p.dtype.itemsize     # weights (resident, read once)
            + N_PAD * 4                          # bias
            + B * N_PAD * 4                      # logits writeback
        ),
    )

    out = pl.pallas_call(
        classify_kernel,
        out_shape=jax.ShapeDtypeStruct((B, N_PAD), jnp.float32),
        grid=grid,
        in_specs=[
            pl.BlockSpec((TB, K), lambda i: (i, 0)),      # feature tile: pipelined, f32, full-K block
            pl.BlockSpec((K, N_PAD), lambda i: (0, 0)),   # weights: constant block -> VMEM-resident
            pl.BlockSpec((1, N_PAD), lambda i: (0, 0)),   # bias:    constant block -> VMEM-resident
        ],
        out_specs=pl.BlockSpec((TB, N_PAD), lambda i: (i, 0)),
        compiler_params=pltpu.CompilerParams(
            dimension_semantics=("parallel",),            # v7x: shard batch tiles across 2 TCs
        ),
        cost_estimate=cost,
    )(feat, w_p, b_p)

    # 8 -> 3 lane slice: touches 32 B/row (was 512 B/row with the 128-wide padded output).
    return out[:, :N]


def reference_head(feat, w, b, weight_dtype=jnp.bfloat16):
    # Same bf16 input rounding / f32 accumulation as the kernel for apples-to-apples comparison.
    return jnp.dot(
        feat.astype(weight_dtype), w.astype(weight_dtype),
        preferred_element_type=jnp.float32,
    ) + b.astype(jnp.float32)


if __name__ == "__main__":
    key = jax.random.PRNGKey(0)
    kf, kw, kb = jax.random.split(key, 3)

    B, IN, OUT = 8, IN_FEATURES, OUT_FEATURES
    # Backbone (PoolFormer-s12) output features feeding the classifier: (B, 1000)
    feat = jax.random.normal(kf, (B, IN), jnp.float32)

    # nn.Linear(1000, 3) params, stored as (in, out) so the kernel computes x @ W + b
    bound = 1.0 / (IN ** 0.5)
    w = jax.random.uniform(kw, (IN, OUT), jnp.float32, -bound, bound)
    b = jax.random.uniform(kb, (OUT,), jnp.float32, -bound, bound)

    out = jax.block_until_ready(classify_head(feat, w, b))
    ref = reference_head(feat, w, b)

    assert out.shape == (B, OUT)
    assert jnp.allclose(out, ref, atol=2e-3, rtol=2e-3), "mismatch vs reference"

    print("KERNEL_OK")
</pallas_src>

<mosaic_0001>
module attributes {stable_mosaic.version = 11 : i64} {
  func.func @classify_kernel(%arg0: i32, %arg1: memref<8x1000xf32, #tpu.memory_space<vmem>>, %arg2: memref<1000x8xbf16, #tpu.memory_space<vmem>>, %arg3: memref<1x8xf32, #tpu.memory_space<vmem>>, %arg4: memref<8x8xf32, #tpu.memory_space<vmem>>) attributes {dimension_semantics = [#tpu.dimension_semantics<parallel>], iteration_bounds = array<i64: 1>, scalar_prefetch = 0 : i64, scratch_operands = 0 : i64, tpu.core_type = #tpu.core_type<tc>, window_params = [{transform_indices = @transform_0, window_bounds = array<i64: 8, 1000>}, {pipeline_mode = #tpu.pipeline_mode<synchronous>, transform_indices = @transform_1, window_bounds = array<i64: 1000, 8>}, {pipeline_mode = #tpu.pipeline_mode<synchronous>, transform_indices = @transform_2, window_bounds = array<i64: 1, 8>}, {transform_indices = @transform_3, window_bounds = array<i64: 8, 8>}]} {
    %c0 = arith.constant 0 : index
    %c0_0 = arith.constant 0 : index
    %0 = vector.load %arg1[%c0, %c0_0] : memref<8x1000xf32, #tpu.memory_space<vmem>>, vector<8x1000xf32>
    %1 = arith.truncf %0 : vector<8x1000xf32> to vector<8x1000xbf16>
    %c0_1 = arith.constant 0 : index
    %c0_2 = arith.constant 0 : index
    %2 = vector.load %arg2[%c0_1, %c0_2] : memref<1000x8xbf16, #tpu.memory_space<vmem>>, vector<1000x8xbf16>
    %cst = arith.constant dense<0.000000e+00> : vector<8x8xf32>
    %3 = tpu.matmul %1, %2, %cst {dimension_numbers = #tpu.dot_dimension_numbers<[1], [0], [0], [1], [0, 0, 1, 1], [], []>} : vector<8x1000xbf16>, vector<1000x8xbf16>, vector<8x8xf32> -> vector<8x8xf32>
    %c0_3 = arith.constant 0 : index
    %c0_4 = arith.constant 0 : index
    %4 = vector.load %arg3[%c0_3, %c0_4] : memref<1x8xf32, #tpu.memory_space<vmem>>, vector<1x8xf32>
    %5 = vector.broadcast %4 : vector<1x8xf32> to vector<8x8xf32>
    %6 = arith.addf %3, %5 : vector<8x8xf32>
    %c0_5 = arith.constant 0 : index
    %c0_6 = arith.constant 0 : index
    %7 = vector.load %arg4[%c0_5, %c0_6] : memref<8x8xf32, #tpu.memory_space<vmem>>, vector<8x8xf32>
    tpu.vector_store %arg4[%c0_5, %c0_6], %6 {strides = array<i32>} : memref<8x8xf32, #tpu.memory_space<vmem>>, vector<8x8xf32>,
    return
  }
  func.func @transform_0(%arg0: i32) -> (i32, i32) {
    %c0_i32 = arith.constant 0 : i32
    %c0_i32_0 = arith.constant 0 : i32
    return %arg0, %c0_i32 : i32, i32
  }
  func.func @transform_1(%arg0: i32) -> (i32, i32) {
    %c0_i32 = arith.constant 0 : i32
    %c0_i32_0 = arith.constant 0 : i32
    %c0_i32_1 = arith.constant 0 : i32
    return %c0_i32, %c0_i32_0 : i32, i32
  }
  func.func @transform_2(%arg0: i32) -> (i32, i32) {
    %c0_i32 = arith.constant 0 : i32
    %c0_i32_0 = arith.constant 0 : i32
    %c0_i32_1 = arith.constant 0 : i32
    return %c0_i32, %c0_i32_0 : i32, i32
  }
  func.func @transform_3(%arg0: i32) -> (i32, i32) {
    %c0_i32 = arith.constant 0 : i32
    %c0_i32_0 = arith.constant 0 : i32
    return %arg0, %c0_i32 : i32, i32
  }
}

</mosaic_0001>

<bundles_post_ra>
// kernel: tpu_custom_call.1
= control target key start
LH: loop header
LB: loop body
LE: loop exit
PB: predicated region body
PF: predicated region fallthrough
CT: control target
= control target key end

     0   :  { %v943_v41 = vmov 0   ;;  %vm539_vm0 = vcmask 850944   ;;  %s1208_s0 = inlined_call_operand.vmem [shape: f32[8,1000], index: 0, kind: input, shape index: {}]   ;;  %s1209_s1 = inlined_call_operand.vmem [shape: bf16[1000,8], index: 1, kind: input, shape index: {}]   ;;  %s1210_s2 = inlined_call_operand.vmem [shape: f32[1,8], index: 2, kind: input, shape index: {}]   ;;  %s1211_s3 = inlined_call_operand.hbm [shape: f32[8,8], index: 3, kind: output, shape index: {}]  }
   0x1   :  { %v856_v0 = vld [vmem:[%s1209_s1 + $0x40] sm:$0xff]   ;;  %v860_v4 = vld [vmem:[%s1209_s1 + $0x48] sm:$0xff]   ;;  %v864_v8 = vld [vmem:[%s1209_s1 + $0x50] sm:$0xff]  }
   0x2   :  { %v857_v1 = vld [vmem:[%s1209_s1 + $0xc0] sm:$0xff]   ;;  %788 = vmatprep.subr.bf16.mxu0 %v856_v0  ;;  %v861_v5 = vld [vmem:[%s1209_s1 + $0xc8] sm:$0xff]   ;;  %v865_v9 = vld [vmem:[%s1209_s1 + $0xd0] sm:$0xff]  }
   0x3   :  { %v858_v2 = vld [vmem:[%s1209_s1] sm:$0xff]   ;;  %810 = vmatprep.subr.bf16.mxu1 %v857_v1  ;;  %v862_v6 = vld [vmem:[%s1209_s1 + $0x8] sm:$0xff]   ;;  %v866_v10 = vld [vmem:[%s1209_s1 + $0x10] sm:$0xff]  }
   0x4   :  { %v859_v3 = vld [vmem:[%s1209_s1 + $0x80] sm:$0xff]   ;;  %789 = vmatpush3.bf16.msra.mxu0 %v858_v2  ;;  %v863_v7 = vld [vmem:[%s1209_s1 + $0x88] sm:$0xff]   ;;  %v867_v11 = vld [vmem:[%s1209_s1 + $0x90] sm:$0xff]  }
   0x5   :  { %811 = vmatpush3.bf16.msra.mxu1 %v859_v3  ;;  %790 = vmatprep.subr.bf16.mxu0 %v860_v4  ;;  %v868_v12 = vld [vmem:[%s1209_s1 + $0x58] sm:$0xff]   ;;  %v872_v16 = vld [vmem:[%s1209_s1 + $0x60] sm:$0xff]   ;;  %v876_v20 = vld [vmem:[%s1209_s1 + $0x68] sm:$0xff]  }
   0x6   :  { %812 = vmatprep.subr.bf16.mxu1 %v861_v5  ;;  %v869_v13 = vld [vmem:[%s1209_s1 + $0xd8] sm:$0xff]   ;;  %v873_v17 = vld [vmem:[%s1209_s1 + $0xe0] sm:$0xff]   ;;  %v877_v21 = vld [vmem:[%s1209_s1 + $0xe8] sm:$0xff]  }
   0x7   :  { %v870_v14 = vld [vmem:[%s1209_s1 + $0x18] sm:$0xff]   ;;  %v874_v18 = vld [vmem:[%s1209_s1 + $0x20] sm:$0xff]   ;;  %v878_v22 = vld [vmem:[%s1209_s1 + $0x28] sm:$0xff]  }
   0x8   :  { %791 = vmatpush3.bf16.msra.mxu0 %v862_v6  ;;  %v871_v15 = vld [vmem:[%s1209_s1 + $0x98] sm:$0xff]   ;;  %v875_v19 = vld [vmem:[%s1209_s1 + $0xa0] sm:$0xff]   ;;  %v879_v23 = vld [vmem:[%s1209_s1 + $0xa8] sm:$0xff]  }
   0x9   :  { %813 = vmatpush3.bf16.msra.mxu1 %v863_v7  ;;  %792 = vmatprep.subr.bf16.mxu0 %v864_v8  ;;  %v880_v24 = vld [vmem:[%s1209_s1 + $0x70] sm:$0xff]   ;;  %v884_v28 = vld [vmem:[%s1209_s1 + $0x78] sm:$0xff]   ;;  %v17_v32 = vld [vmem:[%s1208_s0 + $0x8] sm:$0xff] }
   0xa   :  { %814 = vmatprep.subr.bf16.mxu1 %v865_v9  ;;  %v881_v25 = vld [vmem:[%s1209_s1 + $0xf0] sm:$0xff]   ;;  %v885_v29 = vld [vmem:[%s1209_s1 + $0xf8] sm:$0xff]   ;;  %v16_v34 = vld [vmem:[%s1208_s0] sm:$0xff]  ;;  %v25_v35 = vpack.c.bf16 %v17_v32, %v17_v32 }
   0xb   :  { %v882_v26 = vld [vmem:[%s1209_s1 + $0x30] sm:$0xff]   ;;  %v886_v30 = vld [vmem:[%s1209_s1 + $0x38] sm:$0xff]   ;;  %v24_v37 = vpack.c.bf16 %v16_v34, %v16_v34  ;;  %v888_v40 = vld [vmem:[%s1209_s1 + $0x140] sm:$0xff]  }
   0xc   :  { %793 = vmatpush3.bf16.msra.mxu0 %v866_v10  ;;  %v883_v27 = vld [vmem:[%s1209_s1 + $0xb0] sm:$0xff]   ;;  %v887_v31 = vld [vmem:[%s1209_s1 + $0xb8] sm:$0xff]   ;;  %579 = vmatprep.mubr.bf16.mxu0 %v25_v35  ;;  %v889_v42 = vld [vmem:[%s1209_s1 + $0x100] sm:$0xff]  }
   0xd   :  { %815 = vmatpush3.bf16.msra.mxu1 %v867_v11  ;;  %794 = vmatprep.subr.bf16.mxu0 %v868_v12  ;;  %v19_v33 = vld [vmem:[%s1208_s0 + $0x18] sm:$0xff]  ;;  %v18_v38 = vld [vmem:[%s1208_s0 + $0x10] sm:$0xff]  ;;  %v890_v43 = vld [vmem:[%s1209_s1 + $0x180] sm:$0xff]  }
   0xe   :  { %816 = vmatprep.subr.bf16.mxu1 %v869_v13  ;;  %v27_v36 = vpack.c.bf16 %v19_v33, %v19_v33  ;;  %v26_v39 = vpack.c.bf16 %v18_v38, %v18_v38  ;;  %v891_v44 = vld [vmem:[%s1209_s1 + $0x148] sm:$0xff]   ;;  %v894_v47 = vld [vmem:[%s1209_s1 + $0x150] sm:$0xff]   ;;  %v897_v50 = vld [vmem:[%s1209_s1 + $0x158] sm:$0xff]  }
   0xf   :  { %v892_v45 = vld [vmem:[%s1209_s1 + $0x108] sm:$0xff]   ;;  %v895_v48 = vld [vmem:[%s1209_s1 + $0x110] sm:$0xff]   ;;  %v898_v51 = vld [vmem:[%s1209_s1 + $0x118] sm:$0xff]  }
  0x10   :  { %795 = vmatpush3.bf16.msra.mxu0 %v870_v14  ;;  %619 = vmatprep.mubr.bf16.mxu1 %v27_v36  ;;  %v893_v46 = vld [vmem:[%s1209_s1 + $0x188] sm:$0xff]   ;;  %v896_v49 = vld [vmem:[%s1209_s1 + $0x190] sm:$0xff]   ;;  %v899_v52 = vld [vmem:[%s1209_s1 + $0x198] sm:$0xff]  }
  0x11   :  { %817 = vmatpush3.bf16.msra.mxu1 %v871_v15  ;;  %796 = vmatprep.subr.bf16.mxu0 %v872_v16  ;;  %v900_v53 = vld [vmem:[%s1209_s1 + $0x160] sm:$0xff]   ;;  %v903_v56 = vld [vmem:[%s1209_s1 + $0x168] sm:$0xff]   ;;  %v906_v59 = vld [vmem:[%s1209_s1 + $0x170] sm:$0xff]  }
  0x12   :  { %818 = vmatprep.subr.bf16.mxu1 %v873_v17  ;;  %v901_v54 = vld [vmem:[%s1209_s1 + $0x120] sm:$0xff]   ;;  %v904_v57 = vld [vmem:[%s1209_s1 + $0x128] sm:$0xff]   ;;  %v907_v60 = vld [vmem:[%s1209_s1 + $0x130] sm:$0xff]  }
  0x13   :  { %v902_v55 = vld [vmem:[%s1209_s1 + $0x1a0] sm:$0xff]   ;;  %v905_v58 = vld [vmem:[%s1209_s1 + $0x1a8] sm:$0xff]   ;;  %v908_v62 = vld [vmem:[%s1209_s1 + $0x1b0] sm:$0xff]  }
  0x14   :  { %797 = vmatpush3.bf16.msra.mxu0 %v874_v18  ;;  %v21_v61 = vld [vmem:[%s1208_s0 + $0x28] sm:$0xff]  ;;  %v909_v0 = vld [vmem:[%s1209_s1 + $0x178] sm:$0xff]   ;;  %v20_v3 = vld [vmem:[%s1208_s0 + $0x20] sm:$0xff] }
  0x15   :  { %819 = vmatpush3.bf16.msra.mxu1 %v875_v19  ;;  %798 = vmatprep.subr.bf16.mxu0 %v876_v20  ;;  %v29_v63 = vpack.c.bf16 %v21_v61, %v21_v61  ;;  %v910_v1 = vld [vmem:[%s1209_s1 + $0x138] sm:$0xff]   ;;  %v28_v5 = vpack.c.bf16 %v20_v3, %v20_v3 }
  0x16   :  { %820 = vmatprep.subr.bf16.mxu1 %v877_v21  ;;  %v911_v2 = vld [vmem:[%s1209_s1 + $0x1b8] sm:$0xff]  }
  0x17   :  { %v23_v4 = vld [vmem:[%s1208_s0 + $0x38] sm:$0xff] }
  0x18   :  { %799 = vmatpush3.bf16.msra.mxu0 %v878_v22  ;;  %v31_v6 = vpack.c.bf16 %v23_v4, %v23_v4 }
  0x19   :  { %821 = vmatpush3.bf16.msra.mxu1 %v879_v23  ;;  %800 = vmatprep.subr.bf16.mxu0 %v880_v24 }
  0x1a   :  { %822 = vmatprep.subr.bf16.mxu1 %v881_v25 }
  0x1c   :  { %801 = vmatpush3.bf16.msra.mxu0 %v882_v26 }
  0x1d   :  { %823 = vmatpush3.bf16.msra.mxu1 %v883_v27  ;;  %802 = vmatprep.subr.bf16.mxu0 %v884_v28 }
  0x1e   :  { %824 = vmatprep.subr.bf16.mxu1 %v885_v29 }
  0x20   :  { %803 = vmatpush3.bf16.msra.mxu0 %v886_v30 }
  0x21   :  { %825 = vmatpush3.bf16.msra.mxu1 %v887_v31  ;;  %832 = vmatprep.subr.bf16.mxu0 %v888_v40 }
  0x22   :  { %667 = vmatprep.subr.bf16.mxu1 %v943_v41 }
  0x23   :  { %580 = vmatmul.mubr.bf16.vlgmr.msra.gmra.mrb[0].mxu0 %v24_v37 }
  0x24   :  { %620 = vmatmul.mubr.bf16.vlgmr.msra.gmra.mrb[0].mxu1 %v26_v39  ;;  %833 = vmatpush3.bf16.msra.mxu0 %v889_v42 }
  0x25   :  { %668 = vmatpush1.bf16.msra.mxu1 %v890_v43  ;;  %834 = vmatprep.subr.bf16.mxu0 %v891_v44 }
  0x26   :  { %669 = vmatprep.subr.bf16.mxu1 %v943_v41  ;;  %659 = vmatprep.mubr.bf16.mxu0 %v29_v63 }
  0x28   :  { %835 = vmatpush3.bf16.msra.mxu0 %v892_v45 }
  0x29   :  { %670 = vmatpush1.bf16.msra.mxu1 %v893_v46  ;;  %836 = vmatprep.subr.bf16.mxu0 %v894_v47 }
  0x2a   :  { %671 = vmatprep.subr.bf16.mxu1 %v943_v41 }
  0x2c   :  { %837 = vmatpush3.bf16.msra.mxu0 %v895_v48 }
  0x2d   :  { %672 = vmatpush1.bf16.msra.mxu1 %v896_v49  ;;  %838 = vmatprep.subr.bf16.mxu0 %v897_v50 }
  0x2e   :  { %673 = vmatprep.subr.bf16.mxu1 %v943_v41 }
  0x30   :  { %839 = vmatpush3.bf16.msra.mxu0 %v898_v51 }
  0x31   :  { %674 = vmatpush1.bf16.msra.mxu1 %v899_v52  ;;  %840 = vmatprep.subr.bf16.mxu0 %v900_v53 }
  0x32   :  { %675 = vmatprep.subr.bf16.mxu1 %v943_v41 }
  0x34   :  { %841 = vmatpush3.bf16.msra.mxu0 %v901_v54 }
  0x35   :  { %676 = vmatpush1.bf16.msra.mxu1 %v902_v55  ;;  %842 = vmatprep.subr.bf16.mxu0 %v903_v56 }
  0x36   :  { %677 = vmatprep.subr.bf16.mxu1 %v943_v41 }
  0x38   :  { %843 = vmatpush3.bf16.msra.mxu0 %v904_v57 }
  0x39   :  { %678 = vmatpush1.bf16.msra.mxu1 %v905_v58  ;;  %844 = vmatprep.subr.bf16.mxu0 %v906_v59 }
  0x3a   :  { %679 = vmatprep.subr.bf16.mxu1 %v943_v41 }
  0x3c   :  { %845 = vmatpush3.bf16.msra.mxu0 %v907_v60 }
  0x3d   :  { %680 = vmatpush1.bf16.msra.mxu1 %v908_v62  ;;  %846 = vmatprep.subr.bf16.mxu0 %v909_v0 }
  0x3e   :  { %681 = vmatprep.subr.bf16.mxu1 %v943_v41 }
  0x3f   :  { %8 = vsyncpa [#allocation3], 0  ;;  %v912_v7 = vld [vmem:[%s1209_s1 + $0x1c0] sm:$0xff]   ;;  %787 = vmatprep.mubr.msk.bf16.mxu1 %vm539_vm0, %v31_v6  ;;  %v913_v8 = vld [vmem:[%s1209_s1 + $0x1c8] sm:$0xff]   ;;  %vm543_vm1 = vcmask 1043456   ;;  %vm707_vm2 = vcmask 64512  }
  0x40   :  { %847 = vmatpush3.bf16.msra.mxu0 %v910_v1  ;;  %v914_v9 = vld [vmem:[%s1209_s1 + $0x1d0] sm:$0xff]   ;;  %v915_v10 = vld [vmem:[%s1209_s1 + $0x1d8] sm:$0xff]   ;;  %v916_v11 = vld [vmem:[%s1209_s1 + $0x1e0] sm:$0xff]  }
  0x41   :  { %682 = vmatpush1.bf16.msra.mxu1 %v911_v2  ;;  %v917_v12 = vld [vmem:[%s1209_s1 + $0x1e8] sm:$0xff]   ;;  %v918_v13 = vld [vmem:[%s1209_s1 + $0x1f0] ss:$0 sps:$4 sm:$0xff]   ;;  %v723_v19 = vld [vmem:[%s1210_s2] ss:$0 sm:$0xff] }
  0x42   :  { %683 = vmatprep.subr.bf16.mxu1 %v943_v41  ;;  %v22_v14 = vld [vmem:[%s1208_s0 + $0x30] sm:$0xff]  ;;  %v545_v15 = vsel %vm543_vm1, %v918_v13, 0  ;;  %s944_s0 = smov [#allocation2]  }
  0x43   :  { %660 = vmatmul.mubr.bf16.vlgmr.msra.gmra.mrb[4].mxu0 %v28_v5  ;;  %v30_v16 = vpack.c.bf16 %v22_v14, %v22_v14  ;;  %s715_s1 = sshll.u32 %s944_s0, 4  ;;  %s716_s1 = int_to_ptr.vmem [resolvable:$true] %s715_s1 }
  0x44   :  { %s919_s2 = scalar_lea.vmem %s716_s1, 128  ;;  %p924_p1 = scmp.lt.s32.totalorder %s716_s1, %s716_s1 }
  0x45   :  { %684 = vmatpush1.bf16.msra.mxu1 %v912_v7  ;;  %p920_p0 = scmp.ne.s32.totalorder %s716_s1, %s919_s2  ;;  %p925_p2 = scmp.lt.s32.totalorder %s919_s2, %s919_s2 }
  0x46   :  { %685 = vmatprep.subr.bf16.mxu1 %v943_v41 }
  0x47   :  { %p926_p3 = por %p925_p2, %p924_p1 }
  0x49   :  { %686 = vmatpush1.bf16.msra.mxu1 %v913_v8  ;;  %p927_p4 = pnand %p926_p3, %p920_p0 }
  0x4a   :  { %687 = vmatprep.subr.bf16.mxu1 %v943_v41 }
  0x4d   :  { %688 = vmatpush1.bf16.msra.mxu1 %v914_v9 }
  0x4e   :  { %689 = vmatprep.subr.bf16.mxu1 %v943_v41 }
  0x51   :  { %690 = vmatpush1.bf16.msra.mxu1 %v915_v10 }
  0x52   :  { %691 = vmatprep.subr.bf16.mxu1 %v943_v41 }
  0x55   :  { %692 = vmatpush1.bf16.msra.mxu1 %v916_v11 }
  0x56   :  { %693 = vmatprep.subr.bf16.mxu1 %v943_v41 }
  0x59   :  { %694 = vmatpush1.bf16.msra.mxu1 %v917_v12 }
  0x5a   :  { %695 = vmatprep.subr.bf16.mxu1 %v943_v41 }
  0x5d   :  { %696 = vmatpush1.bf16.msra.mxu1 %v545_v15 }
  0x60   :  { %700 = vmatmul.mubr.bf16.vlgmr.msra.gmra.mrb[4].mxu1 %v30_v16 }
  0xf6   :  { %v804_v17 = vpop.f32.mrb[0].mxu0 }
  0xf7   :  { %v826_v18 = vpop.f32.mrb[0].mxu1  ;;  %v805_v20 = vpop.f32.mrb[1].mxu0 }
  0xf8   :  { %v827_v21 = vpop.f32.mrb[1].mxu1  ;;  %v806_v22 = vadd.f32 %v805_v20, %v804_v17  ;;  %v807_v25 = vpop.f32.mrb[2].mxu0 }
  0xf9   :  { %v828_v23 = vadd.f32 %v827_v21, %v826_v18  ;;  %v829_v24 = vpop.f32.mrb[2].mxu1  ;;  %v808_v27 = vpop.f32.mrb[3].mxu0 }
  0xfa   :  { %v830_v26 = vpop.f32.mrb[3].mxu1  ;;  %v582_v28 = vadd.f32 %v806_v22, %v723_v19 }
  0xfc   :  { %v622_v29 = vadd.f32 %v828_v23, %v582_v28 }
 0x116   :  { %v848_v30 = vpop.f32.mrb[4].mxu0 }
 0x117   :  { %v849_v31 = vpop.f32.mrb[5].mxu0 }
 0x118   :  { %v850_v32 = vadd.f32 %v849_v31, %v848_v30  ;;  %v851_v33 = vpop.f32.mrb[6].mxu0 }
 0x119   :  { %v852_v34 = vpop.f32.mrb[7].mxu0 }
 0x11a   :  { %v662_v35 = vadd.f32 %v850_v32, %v622_v29 }
 0x133   :  { %v701_v36 = vpop.f32.mrb[4].mxu1 }
 0x134   :  { %v702_v37 = vadd.f32 %v701_v36, %v662_v35  ;;  %v703_v38 = vpop.f32.mrb[5].mxu1 }
 0x135   :  { %v704_v39 = vpop.f32.mrb[6].mxu1 }
 0x136   :  { %v705_v40 = vpop.f32.mrb[7].mxu1  ;;  %708 = vst.msk [vmem:[#allocation2] sm:$0xff] %vm707_vm2, %v702_v37 }
 0x137   :  { %930 = shalt.err (!%p927_p4)
}
 0x138   :  { %s931_s23 = scalar_lea.hbm %s1211_s3, 128 }
 0x139   :  { %p932_p5 = scmp.ne.s32.totalorder %s1211_s3, %s931_s23  ;;  %p935_p6 = scmp.lt.u32.totalorder %s931_s23, %s1211_s3 }
 0x13b   :  { %p937_p7 = pnand %p935_p6, %p932_p5 }
 0x13d   :  { %940 = shalt.err (!%p937_p7)
}
 0x13e   :  { %718 = dma.vmem_to_hbm [thread:$0]  %s716_s1, 128, %s1211_s3, [#allocation3]  }
 0x13f   :  { %941 = dma.done.wait [#allocation3], 128  }
 0x140   :  { %942 = vsyncadd [#allocation3], 4294967168 }
 0x141   :  { %722 = vsyncpa [#allocation3], 1 }

</bundles_post_ra>
